<compile_context>
chip_gen: v6e
topology: v6e:2x2x1
jax: 0.10.0
libtpu: 0.0.40
codegen_flags: <defaults>
</compile_context>

<pallas_src>
import functools
import math

import jax
import jax.numpy as jnp
from jax.experimental import pallas as pl
from jax.experimental.pallas import tpu as pltpu


# ---------------------------------------------------------------------------
# Tiled matmul kernel:  y = x @ w.T   (PyTorch Linear weight layout: (out, in))
# ---------------------------------------------------------------------------

def _matmul_kernel(x_ref, w_ref, o_ref, acc_ref):
    @pl.when(pl.program_id(2) == 0)
    def _():
        acc_ref[...] = jnp.zeros_like(acc_ref)

    acc_ref[...] += jnp.dot(x_ref[...], w_ref[...],
                            preferred_element_type=jnp.float32)

    @pl.when(pl.program_id(2) == pl.num_programs(2) - 1)
    def _():
        o_ref[...] = acc_ref[...].astype(o_ref.dtype)


def _fit_tile(full: int, pref: int, align: int) -> int:
    """Use the large preferred tile only if it tiles `full` exactly and respects
    the (8,128) alignment; otherwise fall back to the full extent (always legal
    since a block equal to the array dim needs no alignment)."""
    if full % pref == 0 and pref % align == 0:
        return pref
    return full


def linear(x: jax.Array, w: jax.Array, *,
           tm: int = 256, tk: int = 512, tn: int = 256) -> jax.Array:
    """y = x @ w.T with w shaped (out_features, in_features)."""
    M, K = x.shape
    N, K2 = w.shape
    assert K == K2
    wt = w.T                     # (K, N) — one-time layout op outside the kernel

    tm = _fit_tile(M, tm, 8)
    tk = _fit_tile(K, tk, 128)
    tn = _fit_tile(N, tn, 128)
    grid = (M // tm, N // tn, K // tk)

    bytes_accessed = int((M * K + K * N + M * N) * x.dtype.itemsize)
    return pl.pallas_call(
        _matmul_kernel,
        out_shape=jax.ShapeDtypeStruct((M, N), x.dtype),
        grid_spec=pltpu.PrefetchScalarGridSpec(
            num_scalar_prefetch=0,
            grid=grid,
            in_specs=[
                pl.BlockSpec((tm, tk), lambda i, j, k: (i, k)),
                pl.BlockSpec((tk, tn), lambda i, j, k: (k, j)),
            ],
            out_specs=pl.BlockSpec((tm, tn), lambda i, j, k: (i, j)),
            scratch_shapes=[pltpu.VMEM((tm, tn), jnp.float32)],
        ),
        compiler_params=pltpu.CompilerParams(
            dimension_semantics=("parallel", "parallel", "arbitrary"),
            vmem_limit_bytes=64 * 1024 * 1024,
        ),
        cost_estimate=pl.CostEstimate(
            flops=int(2 * M * N * K), transcendentals=0,
            bytes_accessed=bytes_accessed),
    )(x, wt)


# ---------------------------------------------------------------------------
# Flash-style attention kernel (online softmax, GQA via index_map)
# ---------------------------------------------------------------------------

def _flash_attn_kernel(q_ref, k_ref, v_ref, mask_ref, o_ref,
                       m_scr, l_scr, acc_scr, *, scale: float):
    kv = pl.program_id(2)

    @pl.when(kv == 0)
    def _():
        m_scr[...] = jnp.full_like(m_scr, -jnp.inf)
        l_scr[...] = jnp.zeros_like(l_scr)
        acc_scr[...] = jnp.zeros_like(acc_scr)

    q = q_ref[...].astype(jnp.float32)          # (Sq, D)
    k = k_ref[...].astype(jnp.float32)          # (Tkv, D)
    v = v_ref[...].astype(jnp.float32)          # (Tkv, D)

    # scores = q @ k.T * scale + mask   (f32 math, matching scores.float())
    s = jax.lax.dot_general(q, k, (((1,), (1,)), ((), ())),
                            preferred_element_type=jnp.float32) * scale
    s = s + mask_ref[...].astype(jnp.float32)   # (Sq, Tkv)

    m_prev = m_scr[...]
    m_new = jnp.maximum(m_prev, s.max(axis=-1, keepdims=True))
    alpha = jnp.exp(m_prev - m_new)
    p = jnp.exp(s - m_new)
    l_scr[...] = alpha * l_scr[...] + p.sum(axis=-1, keepdims=True)
    acc_scr[...] = alpha * acc_scr[...] + jnp.dot(
        p, v, preferred_element_type=jnp.float32)
    m_scr[...] = m_new

    @pl.when(kv == pl.num_programs(2) - 1)
    def _():
        o_ref[...] = (acc_scr[...] / l_scr[...]).astype(o_ref.dtype)


def flash_attention(q, k, v, mask, *, n_rep: int, block_kv: int = 512):
    """q: (B, H, Sq, D); k/v: (B, Hkv, Skv, D); mask: (Sq, Skv) additive."""
    B, H, Sq, D = q.shape
    _, Hkv, Skv, _ = k.shape
    assert H == Hkv * n_rep
    assert mask.shape == (Sq, Skv)

    scale = 1.0 / math.sqrt(D)
    tkv = _fit_tile(Skv, block_kv, 128)
    grid = (B, H, Skv // tkv)

    bytes_accessed = int((2 * q.size + k.size + v.size + mask.size)
                         * q.dtype.itemsize)
    kernel = functools.partial(_flash_attn_kernel, scale=scale)
    return pl.pallas_call(
        kernel,
        out_shape=jax.ShapeDtypeStruct((B, H, Sq, D), q.dtype),
        grid_spec=pltpu.PrefetchScalarGridSpec(
            num_scalar_prefetch=0,
            grid=grid,
            in_specs=[
                pl.BlockSpec((None, None, Sq, D),
                             lambda b, h, kvi: (b, h, 0, 0)),
                pl.BlockSpec((None, None, tkv, D),
                             lambda b, h, kvi: (b, h // n_rep, kvi, 0)),
                pl.BlockSpec((None, None, tkv, D),
                             lambda b, h, kvi: (b, h // n_rep, kvi, 0)),
                pl.BlockSpec((Sq, tkv), lambda b, h, kvi: (0, kvi)),
            ],
            out_specs=pl.BlockSpec((None, None, Sq, D),
                                   lambda b, h, kvi: (b, h, 0, 0)),
            scratch_shapes=[
                pltpu.VMEM((Sq, 1), jnp.float32),   # running max
                pltpu.VMEM((Sq, 1), jnp.float32),   # running denom
                pltpu.VMEM((Sq, D), jnp.float32),   # running numerator
            ],
        ),
        compiler_params=pltpu.CompilerParams(
            dimension_semantics=("parallel", "parallel", "arbitrary"),
            vmem_limit_bytes=64 * 1024 * 1024,
        ),
        cost_estimate=pl.CostEstimate(
            flops=int(4 * B * H * Sq * Skv * D),
            transcendentals=int(B * H * Sq * Skv),
            bytes_accessed=bytes_accessed),
    )(q, k, v, mask)


# ---------------------------------------------------------------------------
# jnp glue: RoPE, repeat_kv (reference only), freqs
# ---------------------------------------------------------------------------

def precompute_freqs(head_dim: int, max_seq: int, theta: float):
    inv = 1.0 / (theta ** (jnp.arange(0, head_dim, 2, dtype=jnp.float32) / head_dim))
    t = jnp.arange(max_seq, dtype=jnp.float32)
    ang = jnp.outer(t, inv)                          # (max_seq, head_dim//2)
    return jnp.cos(ang), jnp.sin(ang)


def apply_rope(x, cos, sin):
    """x: (B, S, H, D); cos/sin: (S, D//2). Same math as torch.view_as_complex
    on reshape(..., -1, 2) followed by complex multiply with freqs_cis."""
    B, S, H, D = x.shape
    xf = x.astype(jnp.float32).reshape(B, S, H, D // 2, 2)
    xr, xi = xf[..., 0], xf[..., 1]
    c = cos[None, :, None, :]
    s = sin[None, :, None, :]
    outr = xr * c - xi * s
    outi = xr * s + xi * c
    out = jnp.stack([outr, outi], axis=-1).reshape(B, S, H, D)
    return out.astype(x.dtype)


def repeat_kv(x, n_rep: int):
    b, s, h, d = x.shape
    if n_rep == 1:
        return x
    return jnp.broadcast_to(x[:, :, :, None, :],
                            (b, s, h, n_rep, d)).reshape(b, s, h * n_rep, d)


# ---------------------------------------------------------------------------
# Attention.forward (do_kv_compress=False) — Pallas path and jnp reference
# ---------------------------------------------------------------------------

def attention_forward_pallas(x, start_pos, cos_cur, sin_cur, mask, params,
                             cache_k, cache_v, *, n_heads, n_kv_heads, head_dim):
    wq, wk, wv, wo = params["wq"], params["wk"], params["wv"], params["wo"]
    bsz, seqlen, dim = x.shape
    n_rep = n_heads // n_kv_heads
    x2d = x.reshape(bsz * seqlen, dim)

    xq = linear(x2d, wq).reshape(bsz, seqlen, n_heads, head_dim)
    xk = linear(x2d, wk).reshape(bsz, seqlen, n_kv_heads, head_dim)
    xv = linear(x2d, wv).reshape(bsz, seqlen, n_kv_heads, head_dim)

    xq = apply_rope(xq, cos_cur, sin_cur)
    xk = apply_rope(xk, cos_cur, sin_cur)

    cache_k = jax.lax.dynamic_update_slice(cache_k, xk.astype(cache_k.dtype),
                                           (0, start_pos, 0, 0))
    cache_v = jax.lax.dynamic_update_slice(cache_v, xv.astype(cache_v.dtype),
                                           (0, start_pos, 0, 0))
    keys = cache_k[:bsz, :start_pos + seqlen]
    values = cache_v[:bsz, :start_pos + seqlen]

    q = jnp.transpose(xq, (0, 2, 1, 3))          # (B, H,   Sq,  D)
    k = jnp.transpose(keys, (0, 2, 1, 3))        # (B, Hkv, Skv, D)
    v = jnp.transpose(values, (0, 2, 1, 3))      # (B, Hkv, Skv, D)

    attn = flash_attention(q, k, v, mask, n_rep=n_rep)            # (B, H, Sq, D)
    attn = jnp.transpose(attn, (0, 2, 1, 3)).reshape(bsz * seqlen,
                                                     n_heads * head_dim)
    out = linear(attn, wo).reshape(bsz, seqlen, dim)
    return out, cache_k, cache_v


def attention_forward_reference(x, start_pos, cos_cur, sin_cur, mask, params,
                                cache_k, cache_v, *, n_heads, n_kv_heads, head_dim):
    hp = jax.lax.Precision.HIGHEST
    wq, wk, wv, wo = params["wq"], params["wk"], params["wv"], params["wo"]
    bsz, seqlen, dim = x.shape
    n_rep = n_heads // n_kv_heads
    x2d = x.reshape(bsz * seqlen, dim)

    xq = jnp.dot(x2d, wq.T, precision=hp).reshape(bsz, seqlen, n_heads, head_dim)
    xk = jnp.dot(x2d, wk.T, precision=hp).reshape(bsz, seqlen, n_kv_heads, head_dim)
    xv = jnp.dot(x2d, wv.T, precision=hp).reshape(bsz, seqlen, n_kv_heads, head_dim)

    xq = apply_rope(xq, cos_cur, sin_cur)
    xk = apply_rope(xk, cos_cur, sin_cur)

    cache_k = jax.lax.dynamic_update_slice(cache_k, xk, (0, start_pos, 0, 0))
    cache_v = jax.lax.dynamic_update_slice(cache_v, xv, (0, start_pos, 0, 0))
    keys = repeat_kv(cache_k[:bsz, :start_pos + seqlen], n_rep)
    values = repeat_kv(cache_v[:bsz, :start_pos + seqlen], n_rep)

    q = jnp.transpose(xq, (0, 2, 1, 3))
    k = jnp.transpose(keys, (0, 2, 1, 3))
    v = jnp.transpose(values, (0, 2, 1, 3))

    scores = jnp.einsum("bhqd,bhkd->bhqk", q, k,
                        precision=hp) / math.sqrt(head_dim)
    scores = scores + mask[None, None]
    probs = jax.nn.softmax(scores.astype(jnp.float32), axis=-1).astype(q.dtype)
    out = jnp.einsum("bhqk,bhkd->bhqd", probs, v, precision=hp)
    out = jnp.transpose(out, (0, 2, 1, 3)).reshape(bsz * seqlen, -1)
    out = jnp.dot(out, wo.T, precision=hp).reshape(bsz, seqlen, dim)
    return out, cache_k, cache_v


# ---------------------------------------------------------------------------
# Demo / correctness check
# ---------------------------------------------------------------------------

if __name__ == "__main__":
    key = jax.random.PRNGKey(0)

    dim, n_heads, n_kv_heads = 32, 4, 2
    head_dim = dim // n_heads                  # 8
    max_batch, max_seq = 2, 16
    bsz, seqlen, start_pos = 2, 8, 0
    rope_theta = 500000.0

    ks = jax.random.split(key, 5)
    wscale = 1.0 / math.sqrt(dim)
    wq = jax.random.normal(ks[0], (n_heads * head_dim, dim), jnp.float32) * wscale
    wk = jax.random.normal(ks[1], (n_kv_heads * head_dim, dim), jnp.float32) * wscale
    wv = jax.random.normal(ks[2], (n_kv_heads * head_dim, dim), jnp.float32) * wscale
    wo = jax.random.normal(ks[3], (dim, n_heads * head_dim), jnp.float32) * wscale
    x = jax.random.normal(ks[4], (bsz, seqlen, dim), jnp.float32)
    params = dict(wq=wq, wk=wk, wv=wv, wo=wo)

    cache_k = jnp.zeros((max_batch, max_seq, n_kv_heads, head_dim), jnp.float32)
    cache_v = jnp.zeros((max_batch, max_seq, n_kv_heads, head_dim), jnp.float32)

    cos_all, sin_all = precompute_freqs(head_dim, max_seq, rope_theta)
    cos_cur = cos_all[start_pos:start_pos + seqlen]
    sin_cur = sin_all[start_pos:start_pos + seqlen]

    # causal mask of shape (seqlen, start_pos + seqlen), as in llama prefill
    causal = jnp.triu(jnp.full((seqlen, seqlen), -jnp.inf, jnp.float32), k=1)
    mask = jnp.concatenate(
        [jnp.zeros((seqlen, start_pos), jnp.float32), causal], axis=1)

    out, new_ck, new_cv = attention_forward_pallas(
        x, start_pos, cos_cur, sin_cur, mask, params, cache_k, cache_v,
        n_heads=n_heads, n_kv_heads=n_kv_heads, head_dim=head_dim)
    out = jax.block_until_ready(out)

    ref, ref_ck, ref_cv = attention_forward_reference(
        x, start_pos, cos_cur, sin_cur, mask, params, cache_k, cache_v,
        n_heads=n_heads, n_kv_heads=n_kv_heads, head_dim=head_dim)

    assert out.shape == (bsz, seqlen, dim), (out.shape, (bsz, seqlen, dim))
    err = float(jnp.max(jnp.abs(out - ref)))
    assert err < 2e-3, f"mismatch vs reference: max abs err {err}"
    cache_err = float(jnp.max(jnp.abs(new_ck - ref_ck)))
    assert cache_err < 2e-3, f"kv-cache mismatch: max abs err {cache_err}"

    print("KERNEL_OK")
</pallas_src>

<mosaic_0001>
module attributes {stable_mosaic.version = 11 : i64} {
  func.func @_matmul_kernel(%arg0: i32, %arg1: i32, %arg2: i32, %arg3: memref<16x32xf32, #tpu.memory_space<vmem>>, %arg4: memref<32x32xf32, #tpu.memory_space<vmem>>, %arg5: memref<16x32xf32, #tpu.memory_space<vmem>>, %arg6: memref<16x32xf32, #tpu.memory_space<vmem>>) attributes {dimension_semantics = [#tpu.dimension_semantics<parallel>, #tpu.dimension_semantics<parallel>, #tpu.dimension_semantics<arbitrary>], iteration_bounds = array<i64: 1, 1, 1>, scalar_prefetch = 0 : i64, scratch_operands = 1 : i64, tpu.core_type = #tpu.core_type<tc>, window_params = [{transform_indices = @transform_0, window_bounds = array<i64: 16, 32>}, {transform_indices = @transform_1, window_bounds = array<i64: 32, 32>}, {transform_indices = @transform_2, window_bounds = array<i64: 16, 32>}]} {
    %c0_i32 = arith.constant 0 : i32
    %0 = arith.cmpi eq, %arg2, %c0_i32 : i32
    %1 = arith.extui %0 : i1 to i32
    %c0_i32_0 = arith.constant 0 : i32
    %2 = arith.cmpi ne, %1, %c0_i32_0 : i32
    scf.if %2 {
      %cst_10 = arith.constant 0.000000e+00 : f32
      %12 = vector.broadcast %cst_10 : f32 to vector<16x32xf32>
      %c0_11 = arith.constant 0 : index
      %c0_12 = arith.constant 0 : index
      %13 = vector.load %arg6[%c0_11, %c0_12] : memref<16x32xf32, #tpu.memory_space<vmem>>, vector<16x32xf32>
      tpu.vector_store %arg6[%c0_11, %c0_12], %12 {strides = array<i32>} : memref<16x32xf32, #tpu.memory_space<vmem>>, vector<16x32xf32>,
    } else {
    }
    %c0 = arith.constant 0 : index
    %c0_1 = arith.constant 0 : index
    %3 = vector.load %arg6[%c0, %c0_1] : memref<16x32xf32, #tpu.memory_space<vmem>>, vector<16x32xf32>
    %c0_2 = arith.constant 0 : index
    %c0_3 = arith.constant 0 : index
    %4 = vector.load %arg3[%c0_2, %c0_3] : memref<16x32xf32, #tpu.memory_space<vmem>>, vector<16x32xf32>
    %c0_4 = arith.constant 0 : index
    %c0_5 = arith.constant 0 : index
    %5 = vector.load %arg4[%c0_4, %c0_5] : memref<32x32xf32, #tpu.memory_space<vmem>>, vector<32x32xf32>
    %cst = arith.constant dense<0.000000e+00> : vector<16x32xf32>
    %6 = tpu.matmul %4, %5, %cst {dimension_numbers = #tpu.dot_dimension_numbers<[1], [0], [0], [1], [0, 0, 1, 1], [], []>} : vector<16x32xf32>, vector<32x32xf32>, vector<16x32xf32> -> vector<16x32xf32>
    %7 = arith.addf %3, %6 : vector<16x32xf32>
    %c0_6 = arith.constant 0 : index
    %c0_7 = arith.constant 0 : index
    %8 = vector.load %arg6[%c0_6, %c0_7] : memref<16x32xf32, #tpu.memory_space<vmem>>, vector<16x32xf32>
    tpu.vector_store %arg6[%c0_6, %c0_7], %7 {strides = array<i32>} : memref<16x32xf32, #tpu.memory_space<vmem>>, vector<16x32xf32>,
    %c0_i32_8 = arith.constant 0 : i32
    %9 = arith.cmpi eq, %arg2, %c0_i32_8 : i32
    %10 = arith.extui %9 : i1 to i32
    %c0_i32_9 = arith.constant 0 : i32
    %11 = arith.cmpi ne, %10, %c0_i32_9 : i32
    scf.if %11 {
      %c0_10 = arith.constant 0 : index
      %c0_11 = arith.constant 0 : index
      %12 = vector.load %arg6[%c0_10, %c0_11] : memref<16x32xf32, #tpu.memory_space<vmem>>, vector<16x32xf32>
      %c0_12 = arith.constant 0 : index
      %c0_13 = arith.constant 0 : index
      %13 = vector.load %arg5[%c0_12, %c0_13] : memref<16x32xf32, #tpu.memory_space<vmem>>, vector<16x32xf32>
      tpu.vector_store %arg5[%c0_12, %c0_13], %12 {strides = array<i32>} : memref<16x32xf32, #tpu.memory_space<vmem>>, vector<16x32xf32>,
    } else {
    }
    return
  }
  func.func @transform_0(%arg0: i32, %arg1: i32, %arg2: i32) -> (i32, i32) {
    %c0_i32 = arith.constant 0 : i32
    return %arg0, %arg2 : i32, i32
  }
  func.func @transform_1(%arg0: i32, %arg1: i32, %arg2: i32) -> (i32, i32) {
    %c0_i32 = arith.constant 0 : i32
    return %arg2, %arg1 : i32, i32
  }
  func.func @transform_2(%arg0: i32, %arg1: i32, %arg2: i32) -> (i32, i32) {
    %c0_i32 = arith.constant 0 : i32
    return %arg0, %arg1 : i32, i32
  }
}

</mosaic_0001>

<bundles_post_ra>
// kernel: tpu_custom_call.1
= control target key start
LH: loop header
LB: loop body
LE: loop exit
PB: predicated region body
PF: predicated region fallthrough
CT: control target
= control target key end

     0   :  { %7 = vsyncpa [#allocation4], 0  ;;  %s304_s0 = inlined_call_operand.hbm [shape: f32[16,32], index: 0, kind: input, shape index: {}]   ;;  %s305_s1 = inlined_call_operand.hbm [shape: f32[32,32], index: 1, kind: input, shape index: {}]   ;;  %s306_s2 = inlined_call_operand.hbm [shape: f32[16,32], index: 2, kind: output, shape index: {}]  }
   0x1   :  { %8 = vsyncpa [#allocation7], 0 }
   0x2   :  { %9 = vsyncpa [#allocation5], 0  ;;  %s257_s9 = smov [#allocation3]  }
   0x3   :  { %s15_s10 = sshll.u32 %s257_s9, 4  ;;  %s16_s10 = int_to_ptr.vmem [resolvable:$true] %s15_s10 }
   0x4   :  { %s199_s11 = scalar_lea.vmem %s16_s10, 256  ;;  %p204_p1 = scmp.lt.s32.totalorder %s16_s10, %s16_s10 }
   0x5   :  { %p200_p0 = scmp.ne.s32.totalorder %s16_s10, %s199_s11  ;;  %p205_p2 = scmp.lt.s32.totalorder %s199_s11, %s199_s11 }
   0x7   :  { %p206_p3 = por %p205_p2, %p204_p1 }
   0x9   :  { %p207_p4 = pnand %p206_p3, %p200_p0 }
   0xb   :  { %210 = shalt.err (!%p207_p4)
}
   0xc   :  { %s258_s12 = smov 128   ;;  %s259_s13 = smov 8  }
   0xd   :  { %21 = dma.hbm_to_vmem [thread:$0]  %s304_s0, 256, %s16_s10, [#allocation4], %s258_s12, %s258_s12, %s259_s13  }
   0xe   :  { %s260_s16 = smov [#allocation6]  }
   0xf   :  { %s27_s17 = sshll.u32 %s260_s16, 4  ;;  %s28_s17 = int_to_ptr.vmem [resolvable:$true] %s27_s17 }
  0x10   :  { %s219_s18 = scalar_lea.vmem %s28_s17, 512  ;;  %p224_p6 = scmp.lt.s32.totalorder %s28_s17, %s28_s17 }
  0x11   :  { %p220_p5 = scmp.ne.s32.totalorder %s28_s17, %s219_s18  ;;  %p225_p7 = scmp.lt.s32.totalorder %s219_s18, %s219_s18 }
  0x13   :  { %p226_p8 = por %p225_p7, %p224_p6 }
  0x15   :  { %p227_p9 = pnand %p226_p8, %p220_p5 }
  0x17   :  { %230 = shalt.err (!%p227_p9)
}
  0x18   :  { %33 = dma.hbm_to_vmem [thread:$0]  %s305_s1, 512, %s28_s17, [#allocation7], %s258_s12, %s258_s12, %s259_s13  }
  0x19   :  { %251 = dma.done.wait [#allocation4], 256  }
  0x1a   :  { %252 = vsyncadd [#allocation4], 4294967040 }
  0x1b   :  { %253 = dma.done.wait [#allocation7], 512  }
  0x1c   :  { %254 = vsyncadd [#allocation7], 4294966784  ;;  %vm44_vm0 = vcmask 261120   ;;  %v261_v0 = vmov 0.0   ;;  %v54_v1 = vld [vmem:[#allocation6 + $0x18] sm:$0xff]  ;;  %v53_v2 = vld [vmem:[#allocation6 + $0x10] sm:$0xff] }
  0x1d   :  { %46 = vst.msk [vmem:[#allocation2 + $0x8] sm:$0xff] %vm44_vm0, %v261_v0  ;;  %45 = vst.msk [vmem:[#allocation2] sm:$0xff] %vm44_vm0, %v261_v0  ;;  %174 = vmatprep.subr.mxu0 %v54_v1  ;;  %v49_v3 = vld [vmem:[#allocation3] sm:$0xff]  ;;  %v52_v4 = vld [vmem:[#allocation6 + $0x8] sm:$0xff]  ;;  %s262_s0 = smov [#allocation8]  }
  0x1e   :  { %175 = vmatpush3.msra.mxu0 %v54_v1  ;;  %182 = vmatprep.mubr.msk.f32.mxu0 %vm44_vm0, %v49_v3  ;;  %v51_v5 = vld [vmem:[#allocation6] sm:$0xff]  ;;  %v50_v6 = vld [vmem:[#allocation3 + $0x8] sm:$0xff]  ;;  %s153_s1 = sshll.u32 %s262_s0, 4  ;;  %s154_s1 = int_to_ptr.vmem [resolvable:$true] %s153_s1 }
  0x1f   :  { %176 = vmatprep.subr.mxu0 %v53_v2  ;;  %s231_s21 = scalar_lea.vmem %s154_s1, 256  ;;  %p236_p11 = scmp.lt.s32.totalorder %s154_s1, %s154_s1 }
  0x20   :  { %177 = vmatpush3.msra.mxu0 %v53_v2  ;;  %p232_p10 = scmp.ne.s32.totalorder %s154_s1, %s231_s21  ;;  %p237_p12 = scmp.lt.s32.totalorder %s231_s21, %s231_s21 }
  0x21   :  { %178 = vmatprep.subr.mxu0 %v52_v4 }
  0x22   :  { %179 = vmatpush3.msra.mxu0 %v52_v4  ;;  %p238_p13 = por %p237_p12, %p236_p11 }
  0x23   :  { %180 = vmatprep.subr.mxu0 %v51_v5 }
  0x24   :  { %181 = vmatpush3.msra.mxu0 %v51_v5  ;;  %v48_v7 = vld [vmem:[#allocation2 + $0x8] sm:$0xff]  ;;  %v47_v9 = vld [vmem:[#allocation2] sm:$0xff]  ;;  %p239_p0 = pnand %p238_p13, %p232_p10 }
  0x25   :  { %183 = vmatmul.mubr.msk.f32.vlgmr.msra.gmra.mxu0 %vm44_vm0, %v50_v6 }
  0xe5   :  { %v184_v8 = vpop.f32.mrf.mxu0 }
  0xe6   :  { %v138_v10 = vadd.f32 %v184_v8, %v48_v7 }
  0xe7   :  { %v128_v11 = vpop.f32.mrf.mxu0 }
  0xe8   :  { %140 = vst.msk [vmem:[#allocation2 + $0x8] sm:$0xff] %vm44_vm0, %v138_v10  ;;  %v137_v12 = vadd.f32 %v128_v11, %v47_v9 }
  0xea   :  { %139 = vst.msk [vmem:[#allocation2] sm:$0xff] %vm44_vm0, %v137_v12 }
  0xef   :  { %v145_v13 = vld [vmem:[#allocation2 + $0x8] sm:$0xff] }
  0xf0   :  { %147 = vst.msk [vmem:[#allocation8 + $0x8] sm:$0xff] %vm44_vm0, %v145_v13 }
  0xf1   :  { %v144_v14 = vld [vmem:[#allocation2] sm:$0xff] }
  0xf2   :  { %146 = vst.msk [vmem:[#allocation8] sm:$0xff] %vm44_vm0, %v144_v14 }
  0xf3   :  { %242 = shalt.err (!%p239_p0)
}
  0xf4   :  { %159 = dma.vmem_to_hbm [thread:$0]  %s154_s1, 256, %s306_s2, [#allocation5], %s258_s12, %s258_s12, %s259_s13  }
  0xf5   :  { %255 = dma.done.wait [#allocation5], 256  }
  0xf6   :  { %256 = vsyncadd [#allocation5], 4294967040 }
  0xf7   :  { %163 = vsyncpa [#allocation4], 1 }
  0xf8   :  { %164 = vsyncpa [#allocation7], 1 }
  0xf9   :  { %165 = vsyncpa [#allocation5], 1 }

</bundles_post_ra>
